<compile_context>
chip_gen: v7x
topology: tpu7x:2x2x1
jax: 0.10.0
libtpu: 0.0.40
codegen_flags: <defaults>
</compile_context>

<pallas_src>
import functools

import jax
import jax.numpy as jnp
from jax.experimental import pallas as pl
from jax.experimental.pallas import tpu as pltpu


def _round_up(x, m):
    return ((x + m - 1) // m) * m


def _finetune_fc_kernel(x_ref, w_ref, b_ref, o_ref, acc_ref, *,
                        n_tokens, with_cls_token):
    """Accumulate token sums over the N grid axis; finalize on the last step."""
    k = pl.program_id(1)

    xblk = x_ref[...]                                             # (TB, TN, D)
    # Partial token sum in f32 (no full-block f32 copy kept live).
    block_sum = jnp.sum(xblk, axis=1, dtype=jnp.float32)          # (TB, D)

    @pl.when(k == 0)
    def _init():
        init = block_sum
        if with_cls_token:
            # Drop the CLS token by subtraction (keeps the reduction on
            # aligned full tiles; CLS row lives in token block k == 0).
            init = init - xblk[:, 0, :].astype(jnp.float32)
        acc_ref[...] = init

    @pl.when(k > 0)
    def _accum():
        acc_ref[...] += block_sum

    @pl.when(k == pl.num_programs(1) - 1)
    def _finalize():
        denom = float(n_tokens - 1 if with_cls_token else n_tokens)
        pooled = acc_ref[...] * (1.0 / denom)                     # (TB, D)
        logits = jnp.dot(pooled, w_ref[...].astype(jnp.float32),
                         preferred_element_type=jnp.float32)      # (TB, Cp)
        o_ref[...] = (logits + b_ref[...].astype(jnp.float32)).astype(o_ref.dtype)


def fine_tuner_forward(x, w_t, b, *, with_cls_token=False, tb=8, tn=128):
    """FineTuner (tune_type='fc') forward.

    x:   (B, N, D) token features produced by the feature model.
    w_t: (D, C)    = head.weight.T
    b:   (C,)      = head.bias
    """
    B, N, D = x.shape
    C = w_t.shape[1]

    # Lane-dense output & weights: pad class dim to a multiple of 128 lanes.
    C_pad = _round_up(C, 128)
    # Feature dim: pad to a multiple of 128 so x's lane dim and w's sublane
    # dim are tile-aligned (zeros contribute nothing to the matmul).
    D_pad = _round_up(D, 128)
    # Batch tile: multiple of 8 so the (TB, C_pad) output block is tile-aligned.
    tb = max(8, _round_up(min(tb, _round_up(B, 8)), 8))
    B_pad = _round_up(B, tb)
    # Token tile: multiple of 8 (sublane axis of the x block).
    tn = max(8, _round_up(min(tn, _round_up(N, 8)), 8))
    N_pad = _round_up(N, tn)

    x_p = x
    if (B_pad, N_pad, D_pad) != (B, N, D):
        x_p = jnp.pad(x, ((0, B_pad - B), (0, N_pad - N), (0, D_pad - D)))
    w_p = w_t
    if (D_pad, C_pad) != (D, C):
        w_p = jnp.pad(w_t, ((0, D_pad - D), (0, C_pad - C)))
    b_p = (b if C_pad == C else jnp.pad(b, (0, C_pad - C))).reshape(1, C_pad)

    grid = (B_pad // tb, N_pad // tn)
    kernel = functools.partial(_finetune_fc_kernel,
                               n_tokens=N, with_cls_token=with_cls_token)

    out = pl.pallas_call(
        kernel,
        out_shape=jax.ShapeDtypeStruct((B_pad, C_pad), jnp.float32),
        grid_spec=pltpu.PrefetchScalarGridSpec(
            num_scalar_prefetch=0,
            grid=grid,
            in_specs=[
                # streamed token blocks (double-buffered by the pipeline)
                pl.BlockSpec((tb, tn, D_pad), lambda i, k: (i, k, 0)),
                # head weight / bias: constant index_map -> resident in VMEM
                pl.BlockSpec((D_pad, C_pad), lambda i, k: (0, 0)),
                pl.BlockSpec((1, C_pad), lambda i, k: (0, 0)),
            ],
            # same output block across the token (reduction) axis
            out_specs=pl.BlockSpec((tb, C_pad), lambda i, k: (i, 0)),
            scratch_shapes=[pltpu.VMEM((tb, D_pad), jnp.float32)],
        ),
        compiler_params=pltpu.CompilerParams(
            # batch axis shardable across TensorCores; token axis is the
            # reduction and must stay "arbitrary".
            dimension_semantics=("parallel", "arbitrary"),
            # Tiles here are tiny; for large (TB, TN, D) blocks raise
            # vmem_limit_bytes while keeping 2 buffers well under 64 MiB (v7x).
        ),
    )(x_p, w_p, b_p)

    return out[:B, :C]


def _reference(x, w_t, b, *, with_cls_token=False):
    feats = x.astype(jnp.float32)
    if with_cls_token:
        feats = feats[:, 1:, :]
    pooled = feats.mean(axis=1)
    return pooled @ w_t.astype(jnp.float32) + b.astype(jnp.float32)


if __name__ == "__main__":
    # Small shapes consistent with the module's forward:
    #   token features (B, N, D), head: Linear(feature_dim=D -> num_classes=C).
    # N and B chosen to exercise token streaming + padding paths.
    B, N, D, C = 10, 50, 256, 10

    key = jax.random.PRNGKey(0)
    kx, kw, kb = jax.random.split(key, 3)

    # "feature_model" output (identity backbone): token features (B, N, D)
    x = jax.random.normal(kx, (B, N, D), dtype=jnp.float32)

    # Deterministic head parameters, matching nn.Linear(D, C) init style
    # (uniform in [-1/sqrt(D), 1/sqrt(D)]); stored transposed as (D, C).
    bound = 1.0 / (D ** 0.5)
    w_t = jax.random.uniform(kw, (D, C), minval=-bound, maxval=bound,
                             dtype=jnp.float32)
    b = jax.random.uniform(kb, (C,), minval=-bound, maxval=bound,
                           dtype=jnp.float32)

    # tn=16 -> multiple token blocks per batch tile (exercises accumulation).
    out = fine_tuner_forward(x, w_t, b, with_cls_token=False, tb=8, tn=16)
    out = jax.block_until_ready(out)
    ref = _reference(x, w_t, b, with_cls_token=False)
    assert out.shape == (B, C)
    assert jnp.allclose(out, ref, atol=1e-4, rtol=1e-4), "mismatch (no CLS)"

    out_cls = fine_tuner_forward(x, w_t, b, with_cls_token=True, tb=8, tn=16)
    out_cls = jax.block_until_ready(out_cls)
    ref_cls = _reference(x, w_t, b, with_cls_token=True)
    assert out_cls.shape == (B, C)
    assert jnp.allclose(out_cls, ref_cls, atol=1e-4, rtol=1e-4), "mismatch (CLS)"

    # Default larger token tile (single token block per batch tile).
    out_big = fine_tuner_forward(x, w_t, b, with_cls_token=False)
    out_big = jax.block_until_ready(out_big)
    assert jnp.allclose(out_big, ref, atol=1e-4, rtol=1e-4), "mismatch (big tile)"

    print("KERNEL_OK")
</pallas_src>

<mosaic_0001>
module attributes {stable_mosaic.version = 11 : i64} {
  func.func @_finetune_fc_kernel(%arg0: i32, %arg1: i32, %arg2: memref<8x16x256xf32, #tpu.memory_space<vmem>>, %arg3: memref<256x128xf32, #tpu.memory_space<vmem>>, %arg4: memref<1x128xf32, #tpu.memory_space<vmem>>, %arg5: memref<8x128xf32, #tpu.memory_space<vmem>>, %arg6: memref<8x256xf32, #tpu.memory_space<vmem>>) attributes {dimension_semantics = [#tpu.dimension_semantics<parallel>, #tpu.dimension_semantics<arbitrary>], iteration_bounds = array<i64: 2, 4>, scalar_prefetch = 0 : i64, scratch_operands = 1 : i64, tpu.core_type = #tpu.core_type<tc>, window_params = [{transform_indices = @transform_0, window_bounds = array<i64: 8, 16, 256>}, {pipeline_mode = #tpu.pipeline_mode<synchronous>, transform_indices = @transform_1, window_bounds = array<i64: 256, 128>}, {pipeline_mode = #tpu.pipeline_mode<synchronous>, transform_indices = @transform_2, window_bounds = array<i64: 1, 128>}, {transform_indices = @transform_3, window_bounds = array<i64: 8, 128>}]} {
    %c0 = arith.constant 0 : index
    %c0_0 = arith.constant 0 : index
    %c0_1 = arith.constant 0 : index
    %0 = vector.load %arg2[%c0, %c0_0, %c0_1] : memref<8x16x256xf32, #tpu.memory_space<vmem>>, vector<8x16x256xf32>
    %cst = arith.constant dense<0.000000e+00> : vector<8x256xf32>
    %1 = vector.multi_reduction <add>, %0, %cst [1] : vector<8x16x256xf32> to vector<8x256xf32>
    %c0_i32 = arith.constant 0 : i32
    %2 = arith.cmpi eq, %arg1, %c0_i32 : i32
    %3 = arith.extui %2 : i1 to i32
    %c0_i32_2 = arith.constant 0 : i32
    %4 = arith.cmpi ne, %3, %c0_i32_2 : i32
    scf.if %4 {
      %c0_6 = arith.constant 0 : index
      %c0_7 = arith.constant 0 : index
      %11 = vector.load %arg6[%c0_6, %c0_7] : memref<8x256xf32, #tpu.memory_space<vmem>>, vector<8x256xf32>
      tpu.vector_store %arg6[%c0_6, %c0_7], %1 {strides = array<i32>} : memref<8x256xf32, #tpu.memory_space<vmem>>, vector<8x256xf32>,
    } else {
    }
    %c0_i32_3 = arith.constant 0 : i32
    %5 = arith.cmpi sgt, %arg1, %c0_i32_3 : i32
    %6 = arith.extui %5 : i1 to i32
    %c0_i32_4 = arith.constant 0 : i32
    %7 = arith.cmpi ne, %6, %c0_i32_4 : i32
    scf.if %7 {
      %c0_6 = arith.constant 0 : index
      %c0_7 = arith.constant 0 : index
      %11 = vector.load %arg6[%c0_6, %c0_7] : memref<8x256xf32, #tpu.memory_space<vmem>>, vector<8x256xf32>
      %12 = arith.addf %11, %1 : vector<8x256xf32>
      %c0_8 = arith.constant 0 : index
      %c0_9 = arith.constant 0 : index
      %13 = vector.load %arg6[%c0_8, %c0_9] : memref<8x256xf32, #tpu.memory_space<vmem>>, vector<8x256xf32>
      tpu.vector_store %arg6[%c0_8, %c0_9], %12 {strides = array<i32>} : memref<8x256xf32, #tpu.memory_space<vmem>>, vector<8x256xf32>,
    } else {
    }
    %c3_i32 = arith.constant 3 : i32
    %8 = arith.cmpi eq, %arg1, %c3_i32 : i32
    %9 = arith.extui %8 : i1 to i32
    %c0_i32_5 = arith.constant 0 : i32
    %10 = arith.cmpi ne, %9, %c0_i32_5 : i32
    scf.if %10 {
      %c0_6 = arith.constant 0 : index
      %c0_7 = arith.constant 0 : index
      %11 = vector.load %arg6[%c0_6, %c0_7] : memref<8x256xf32, #tpu.memory_space<vmem>>, vector<8x256xf32>
      %cst_8 = arith.constant 2.000000e-02 : f32
      %12 = vector.broadcast %cst_8 : f32 to vector<8x256xf32>
      %13 = arith.mulf %11, %12 : vector<8x256xf32>
      %c0_9 = arith.constant 0 : index
      %c0_10 = arith.constant 0 : index
      %14 = vector.load %arg3[%c0_9, %c0_10] : memref<256x128xf32, #tpu.memory_space<vmem>>, vector<256x128xf32>
      %cst_11 = arith.constant dense<0.000000e+00> : vector<8x128xf32>
      %15 = tpu.matmul %13, %14, %cst_11 {dimension_numbers = #tpu.dot_dimension_numbers<[1], [0], [0], [1], [0, 0, 1, 1], [], []>} : vector<8x256xf32>, vector<256x128xf32>, vector<8x128xf32> -> vector<8x128xf32>
      %c0_12 = arith.constant 0 : index
      %c0_13 = arith.constant 0 : index
      %16 = vector.load %arg4[%c0_12, %c0_13] : memref<1x128xf32, #tpu.memory_space<vmem>>, vector<1x128xf32>
      %17 = vector.broadcast %16 : vector<1x128xf32> to vector<8x128xf32>
      %18 = arith.addf %15, %17 : vector<8x128xf32>
      %c0_14 = arith.constant 0 : index
      %c0_15 = arith.constant 0 : index
      %19 = vector.load %arg5[%c0_14, %c0_15] : memref<8x128xf32, #tpu.memory_space<vmem>>, vector<8x128xf32>
      tpu.vector_store %arg5[%c0_14, %c0_15], %18 {strides = array<i32>} : memref<8x128xf32, #tpu.memory_space<vmem>>, vector<8x128xf32>,
    } else {
    }
    return
  }
  func.func @transform_0(%arg0: i32, %arg1: i32) -> (i32, i32, i32) {
    %c0_i32 = arith.constant 0 : i32
    %c0_i32_0 = arith.constant 0 : i32
    return %arg0, %arg1, %c0_i32 : i32, i32, i32
  }
  func.func @transform_1(%arg0: i32, %arg1: i32) -> (i32, i32) {
    %c0_i32 = arith.constant 0 : i32
    %c0_i32_0 = arith.constant 0 : i32
    %c0_i32_1 = arith.constant 0 : i32
    return %c0_i32, %c0_i32_0 : i32, i32
  }
  func.func @transform_2(%arg0: i32, %arg1: i32) -> (i32, i32) {
    %c0_i32 = arith.constant 0 : i32
    %c0_i32_0 = arith.constant 0 : i32
    %c0_i32_1 = arith.constant 0 : i32
    return %c0_i32, %c0_i32_0 : i32, i32
  }
  func.func @transform_3(%arg0: i32, %arg1: i32) -> (i32, i32) {
    %c0_i32 = arith.constant 0 : i32
    %c0_i32_0 = arith.constant 0 : i32
    return %arg0, %c0_i32 : i32, i32
  }
}

</mosaic_0001>

<bundles_post_ra>
// kernel: tpu_custom_call.1
= control target key start
LH: loop header
LB: loop body
LE: loop exit
PB: predicated region body
PF: predicated region fallthrough
CT: control target
= control target key end

     0   :  { %s1428_s0 = inlined_call_operand.hbm [shape: f32[16,64,256], index: 0, kind: input, shape index: {}]   ;;  %s1429_s1 = inlined_call_operand.hbm [shape: f32[256,128], index: 1, kind: input, shape index: {}]   ;;  %s1430_s2 = inlined_call_operand.vmem [shape: f32[1,128], index: 2, kind: input, shape index: {}]   ;;  %s1431_s3 = inlined_call_operand.hbm [shape: f32[16,128], index: 3, kind: output, shape index: {}]  }
   0x1   :  { %1442 = sst [smem:[#allocation21_spill]] %s1429_s1 }
   0x2   :  { %8 = vsyncpa [#allocation4], 0 }
   0x3   :  { %10 = vsyncpa [#allocation4 + $0x1], 0 }
   0x4   :  { %11 = vsyncpa [#allocation7], 0 }
   0x5   :  { %12 = vsyncpa [#allocation5], 0 }
   0x6   :  { %14 = vsyncpa [#allocation5 + $0x1], 0  ;;  %s1116_s12 = smov 0   ;;  %s1118_s13 = smov 0  }
   0x7   :  { %s1120_s14 = smov 0   ;;  %s1122_s15 = smov 0  }
   0x8   :  { %s1124_s16 = smov 0   ;;  %s1126_s17 = smov 0  }
   0x9   :  { %s1128_s18 = smov 0   ;;  %s1130_s19 = smov 0  }
   0xa   :  { %s1132_s20 = smov 0   ;;  %s1134_s21 = smov 0  }
   0xb   :  { %s1136_s22 = smov 0  }
   0xc LB: > { %1443 = sst [smem:[#allocation15_spill]] %s1076_s20  ;;  %s713_s23 = sadd.s32 4294967295, %s1084_s22   ;;  %s1084_s22 = sphi %s1136_s22, %s20_s22   ;;  %s1080_s21 = sphi %s1134_s21, %s1468_s21   ;;  %s1076_s20 = sphi %s1132_s20, %s1467_s20   ;;  %s1072_s19 = sphi %s1130_s19, %s1466_s19   ;;  %s1068_s18 = sphi %s1128_s18, %s1475_s18   ;;  %s1064_s17 = sphi %s1126_s17, %s1474_s17   ;;  %s1060_s16 = sphi %s1124_s16, %s1473_s16   ;;  %s1056_s15 = sphi %s1122_s15, %s1472_s15   ;;  %s1052_s14 = sphi %s1120_s14, %s1471_s14   ;;  %s1048_s13 = sphi %s1118_s13, %s1470_s13   ;;  %s1044_s12 = sphi %s1116_s12, %s1469_s12  }
   0xd   : > { %1444 = sst [smem:[#allocation16_spill]] %s1080_s21  ;;  %s714_s24 = sadd.s32 4294967294, %s1084_s22  }
   0xe   : > { %s29_s25 = sadd.s32 1, %s1076_s20  ;;  %s32_s26 = sadd.s32 1, %s1080_s21 }
   0xf   : > { %p30_p0 = scmp.ge.s32.totalorder %s29_s25, 4  ;;  %s41_s27 = sadd.s32 1, %s1064_s17 }
  0x10   : > { %p48_p1 = scmp.ne.s32.totalorder %s1064_s17, %s1060_s16  ;;  %p49_p2 = scmp.eq.s32.totalorder %s1084_s22, 0 }
  0x11   : > { %s1477_s25 = smov (%p30_p0, %s29_s25), 0  ;;  %s1479_s26 = smov (!%p30_p0, %s32_s26), %s1080_s21 }
  0x12   : > { %1445 = sst [smem:[#allocation17_spill]] %s1477_s25  ;;  %s37_s28 = ssub.s32 %s1076_s20, %s1477_s25 }
  0x13   : > { %p1182_p3 = por %p49_p2, %p48_p1  ;;  %p34_p4 = scmp.ge.s32.totalorder %s1479_s26, 2 }
  0x14   : > { %p54_p5 = scmp.ne.s32.totalorder %s1060_s16, %s1056_s15  ;;  %p1187_p6 = scmp.eq.s32.totalorder %s713_s23, 0 }
  0x15   : > { %s1446_s29 = scalar_select %p1182_p3, 1, 0 }
  0x16   : > { %s1447_s30 = scalar_select %p1187_p6, 1, 0 }
  0x17   : > { %s109_s4 = sadd.s32 1, %s1052_s14  ;;  %s1481_s26 = smov (%p34_p4, %s1479_s26), 0 }
  0x18   : > { %1448 = sst [smem:[#allocation18_spill]] %s1481_s26  ;;  %p1196_p7 = por %p1187_p6, %p54_p5 }
  0x19   : > { %p119_p8 = scmp.ne.s32.totalorder %s1052_s14, %s1048_s13  ;;  %s36_s6 = ssub.s32 %s1080_s21, %s1481_s26 }
  0x1a   : > { %s1449_s5 = scalar_select %p1196_p7, 1, 0 }
  0x1b   : > { %p120_p9 = scmp.eq.s32.totalorder %s713_s23, 7  ;;  %s38_s7 = sor.u32 %s37_s28, %s36_s6 }
  0x1c   : > { %p107_p10 = scmp.eq.s32.totalorder %s36_s6, 0  ;;  %p39_p11 = scmp.eq.s32.totalorder %s38_s7, 0 }
  0x1d   : > { %p1204_p12 = por %p120_p9, %p119_p8  ;;  %p125_p13 = scmp.ne.s32.totalorder %s1048_s13, %s1044_s12 }
  0x1e   : > { %s1209_s9 = scalar_select %p107_p10, %s1052_s14, %s109_s4  }
  0x1f   : > { %s1450_s8 = scalar_select %p1204_p12, 1, 0 }
  0x20   : > { %1451 = sst [smem:[#allocation19_spill]] %s1209_s9  ;;  %p126_p0 = scmp.eq.s32.totalorder %s714_s24, 7 }
  0x21   : > { %s1212_s10 = scalar_select %p39_p11, %s1064_s17, %s41_s27  }
  0x22   : > { %p715_p1 = scmp.ge.s32.totalorder %s1084_s22, 1  ;;  %p133_p2 = scmp.lt.s32.totalorder %s1084_s22, 9 }
  0x23   : > { %1452 = sst [smem:[#allocation20_spill]] %s1212_s10  ;;  %p1218_p4 = por %p126_p0, %p125_p13 }
  0x24   : > { %p1222_p5 = pnand %p715_p1, %p133_p2  ;;  %s1086_s23 = smov [#allocation6]  }
  0x25   : > { %s1453_s11 = scalar_select %p1218_p4, 1, 0 }
  0x26   : > { %s1454_s15 = scalar_select %p1222_p5, 1, 0 }
  0x27   : > { %s145_s28 = sshll.u32 %s1086_s23, 4  ;;  %p822_p8 = pneg %p1222_p5  ;;  %s146_s28 = int_to_ptr.vmem [resolvable:$true] %s145_s28 }
  0x28   : > { %s1456_s1 = sld [smem:[#allocation21_spill]] }
  0x29   : > { %p1230_p9 = pnand %p822_p8, %p1187_p6 }
  0x2b   : > { %p932_p11 = pneg %p1230_p9 }
  0x2e   : > { %s930_s6 = scalar_lea.hbm %s1456_s1, 4096 }
  0x2f   : > { %p931_p10 = scmp.ne.s32.totalorder %s1456_s1, %s930_s6  ;;  %p937_p1 = scmp.lt.u32.totalorder %s930_s6, %s1456_s1 }
  0x31   : > { %p933_p13 = pnand %p932_p11, %p931_p10 }
  0x33   : > { %p934_p0 = pneg %p933_p13 }
  0x35   : > { %p939_p2 = pnand %p937_p1, %p934_p0 }
  0x37   : > { %942 = shalt.err (!%p939_p2)
}
  0x38   : > { %s943_s10 = scalar_lea.vmem %s146_s28, 4096  ;;  %p951_p6 = scmp.lt.s32.totalorder %s146_s28, %s146_s28 }
  0x39   : > { %p944_p8 = scmp.ne.s32.totalorder %s146_s28, %s943_s10  ;;  %p952_p7 = scmp.lt.s32.totalorder %s943_s10, %s943_s10 }
  0x3b   : > { %p946_p4 = pnand %p944_p8, %p932_p11  ;;  %p953_p5 = por %p952_p7, %p951_p6 }
  0x3d   : > { %p947_p12 = pneg %p946_p4 }
  0x3f   : > { %p954_p3 = pnand %p953_p5, %p947_p12 }
  0x41   : > { %957 = shalt.err (!%p954_p3)
}
  0x42   : > { %s1087_s26 = smov 128   ;;  %s1088_s24 = smov 8  }
  0x43   : > { %825 = dma.hbm_to_vmem [thread:$0]  (!%p1230_p9), %s1456_s1, 4096, %s146_s28, [#allocation7], %s1087_s26, %s1087_s26, %s1088_s24  }
  0x44   : > { %p717_p10 = scmp.ge.s32.totalorder %s1084_s22, 8 }
  0x46   : > { %158 = sbr.rel (%p717_p10) target bundleno = 94 (0x5e), region = 24 }
  0x4d   : > { %s162_s25 = sand.u32 1, %s1064_s17   ;;  %s738_s10 = sshll.u32 %s1076_s20, 2 }
  0x4e   : > { %s718_s6 = sshll.u32 %s162_s25, 8  ;;  %s739_s23 = sshll.u32 %s1080_s21, 7 }
  0x4f   : > { %s174_s27 = sadd.s32 %s739_s23, %s738_s10  ;;  %s166_s9 = scalar_lea.vmem [#allocation3], %s718_s6 }
  0x50   : > { %s189_s4 = sshll.u32 %s166_s9, 4  ;;  %s723_s28 = sshll.u32 %s174_s27, 7  ;;  %s190_s4 = int_to_ptr.vmem [resolvable:$true] %s189_s4 }
  0x51   : > { %p1457_p3 = scmp.ne.s32.totalorder %s1446_s29, 0  ;;  %s1089_s24 = smov 2048  }
  0x52   : > { %s1090_s1 = smov 512   ;;  %s1091_s20 = smov 2  }
  0x53   : > { %s809_s26 = scalar_select %p1457_p3, [#allocation0], [#allocation11] }
  0x54   : > { %810 = sst [smem:[#allocation10]] (%p1457_p3), %s1089_s24  ;;  %s1092_s10 = smov 256  }
  0x55   : > { %s181_s7 = sld [smem:[%s809_s26]]   ;;  %s176_s23 = scalar_lea.hbm %s1428_s0, %s723_s28 }
  0x56   : > { %811 = sst [smem:[#allocation10 + $0x1]] (%p1457_p3), %s1090_s1  ;;  %s1093_s27 = smov 16  }
  0x57   : > { %812 = sst [smem:[#allocation10 + $0x2]] (%p1457_p3), %s1091_s20  ;;  %s163_s21 = scalar_lea.sflag [#allocation4], %s162_s25 }
  0x58   : > { %813 = sst [smem:[#allocation10 + $0x3]] (%p1457_p3), %s1092_s10  ;;  %s1094_s1 = smov [#allocation9]  }
  0x59   : > { %814 = sst [smem:[#allocation10 + $0x4]] (%p1457_p3), %s1092_s10 }
  0x5a   : > { %815 = sst [smem:[#allocation10 + $0x5]] (%p1457_p3), %s1093_s27 }
  0x5b   : > { %s724_s26 = sshll.u32 %s181_s7, 26 }
  0x5c   : > { %s725_s24 = sadd.s32 134217728, %s724_s26 }
  0x5d   : > { %816 = dma.general (%p1457_p3), %s176_s23, 4096, %s190_s4, %s163_s21, %s1094_s1, [#allocation10], %s725_s24, 0  }
  0x5e PF: > { %p1458_p6 = scmp.ne.s32.totalorder %s1454_s15, 0 }
  0x5f   : > { %s216_s20 = sand.u32 (!%p1458_p6), 1, %s1060_s16   ;;  %p1459_p7 = scmp.ne.s32.totalorder (!%p1458_p6), %s1449_s5, 0 }
  0x60   : > { %214 = sbr.rel (%p1458_p6) target bundleno = 436 (0x1b4), region = 32  ;;  %s727_s9 = sshll.u32 (!%p1458_p6), %s216_s20, 8 }
  0x61   : > { %s217_s28 = scalar_lea.sflag (!%p1458_p6), [#allocation4], %s216_s20  ;;  %s1276_s6 = scalar_lea.vmem (!%p1458_p6), [#allocation3], %s727_s9 }
  0x67   : > { %1031 = dma.done.wait (%p1459_p7), %s217_s28, 4096  }
  0x68   : > { %1033 = vsyncadd (%p1459_p7), %s217_s28, 4294963200  ;;  %p1460_p12 = scmp.ne.s32.totalorder %s1447_s30, 0 }
  0x6a   : > { %1035 = dma.done.wait (%p1460_p12), [#allocation7], 4096  }
  0x6b   : > { %1037 = vsyncadd (%p1460_p12), [#allocation7], 4294963200  ;;  %s244_s21 = sand.u32 1, %s1048_s13   ;;  %v249_v0 = vld [vmem:[%s1276_s6] sm:$0xff]  ;;  %v250_v1 = vld [vmem:[%s1276_s6 + $0x8] sm:$0xff]  ;;  %p730_p4 = scmp.ne.s32.totalorder %s1068_s18, 0 }
  0x6c   : > { %s1289_s29 = sshll.u32 %s244_s21, 3  ;;  %v251_v2 = vld [vmem:[%s1276_s6 + $0x10] sm:$0xff]  ;;  %v252_v3 = vld [vmem:[%s1276_s6 + $0x18] sm:$0xff]  ;;  %v253_v4 = vld [vmem:[%s1276_s6 + $0x20] sm:$0xff]  ;;  %vm413_vm0 = vcmask (!%p730_p4), 1041409   ;;  %vm415_vm1 = vcmask (!%p730_p4), 1042434  }
  0x6d   : > { %v254_v5 = vld [vmem:[%s1276_s6 + $0x28] sm:$0xff]  ;;  %v281_v6 = vadd.f32 %v251_v2, %v249_v0  ;;  %v255_v7 = vld [vmem:[%s1276_s6 + $0x30] sm:$0xff]  ;;  %v256_v8 = vld [vmem:[%s1276_s6 + $0x38] sm:$0xff]  ;;  %v288_v10 = vadd.f32 %v252_v3, %v250_v1  ;;  %s246_s30 = scalar_lea.vmem [#allocation8], %s1289_s29  ;;  %vm417_vm2 = vcmask (!%p730_p4), 1043459   ;;  %vm419_vm3 = vcmask (!%p730_p4), 1044484  }
  0x6e   : > { %v257_v9 = vld [vmem:[%s1276_s6 + $0x40] sm:$0xff]  ;;  %v258_v11 = vld [vmem:[%s1276_s6 + $0x48] sm:$0xff]  ;;  %v259_v12 = vld [vmem:[%s1276_s6 + $0x50] sm:$0xff]  ;;  %v295_v15 = vadd.f32 %v255_v7, %v253_v4  ;;  %v302_v16 = vadd.f32 %v256_v8, %v254_v5  ;;  %vm421_vm4 = vcmask (!%p730_p4), 1045509   ;;  %vm423_vm5 = vcmask (!%p730_p4), 1046534  }
  0x6f   : > { %v260_v13 = vld [vmem:[%s1276_s6 + $0x58] sm:$0xff]  ;;  %v282_v14 = vrot.slane %v281_v6, 4  ;;  %v261_v17 = vld [vmem:[%s1276_s6 + $0x60] sm:$0xff]  ;;  %v262_v18 = vld [vmem:[%s1276_s6 + $0x68] sm:$0xff]  ;;  %v289_v20 = vrot.slane %v288_v10, 4  ;;  %v309_v21 = vadd.f32 %v259_v12, %v257_v9  ;;  %vm425_vm6 = vcmask (!%p730_p4), 1047559  }
  0x70   : > { %v263_v19 = vld [vmem:[%s1276_s6 + $0x70] sm:$0xff]  ;;  %v316_v22 = vadd.f32 %v260_v13, %v258_v11  ;;  %v264_v23 = vld [vmem:[%s1276_s6 + $0x78] sm:$0xff]  ;;  %v296_v25 = vrot.slane %v295_v15, 4  ;;  %v303_v26 = vrot.slane %v302_v16, 4  ;;  %v265_v52 = vld [vmem:[%s1276_s6 + $0x80] sm:$0xff] }
  0x71   : > { %v283_v24 = vadd.f32 %v282_v14, %v281_v6  ;;  %v323_v27 = vadd.f32 %v263_v19, %v261_v17  ;;  %v290_v28 = vadd.f32 %v289_v20, %v288_v10  ;;  %v310_v29 = vrot.slane %v309_v21, 4  ;;  %v266_v53 = vld [vmem:[%s1276_s6 + $0x88] sm:$0xff]  ;;  %v267_v54 = vld [vmem:[%s1276_s6 + $0x90] sm:$0xff]  ;;  %v268_v59 = vld [vmem:[%s1276_s6 + $0x98] sm:$0xff] }
  0x72   : > { %v317_v30 = vrot.slane %v316_v22, 4  ;;  %v330_v31 = vadd.f32 %v264_v23, %v262_v18  ;;  %v297_v33 = vadd.f32 %v296_v25, %v295_v15  ;;  %v304_v34 = vadd.f32 %v303_v26, %v302_v16  ;;  %v269_v60 = vld [vmem:[%s1276_s6 + $0xa0] sm:$0xff]  ;;  %v270_v61 = vld [vmem:[%s1276_s6 + $0xa8] sm:$0xff]  ;;  %v271_v2 = vld [vmem:[%s1276_s6 + $0xb0] sm:$0xff] }
  0x73   : > { %v284_v32 = vrot.slane %v283_v24, 2  ;;  %v324_v35 = vrot.slane %v323_v27, 4  ;;  %v291_v36 = vrot.slane %v290_v28, 2  ;;  %v311_v37 = vadd.f32 %v310_v29, %v309_v21  ;;  %v272_v3 = vld [vmem:[%s1276_s6 + $0xb8] sm:$0xff]  ;;  %v273_v4 = vld [vmem:[%s1276_s6 + $0xc0] sm:$0xff]  ;;  %v274_v9 = vld [vmem:[%s1276_s6 + $0xc8] sm:$0xff] }
  0x74   : > { %v318_v38 = vadd.f32 %v317_v30, %v316_v22  ;;  %v331_v39 = vrot.slane %v330_v31, 4  ;;  %v298_v41 = vrot.slane %v297_v33, 2  ;;  %v305_v42 = vrot.slane %v304_v34, 2  ;;  %v275_v10 = vld [vmem:[%s1276_s6 + $0xd0] sm:$0xff]  ;;  %v276_v11 = vld [vmem:[%s1276_s6 + $0xd8] sm:$0xff]  ;;  %v277_v16 = vld [vmem:[%s1276_s6 + $0xe0] sm:$0xff] }
  0x75   : > { %v285_v40 = vadd.f32 %v284_v32, %v283_v24  ;;  %v325_v43 = vadd.f32 %v324_v35, %v323_v27  ;;  %v292_v44 = vadd.f32 %v291_v36, %v290_v28  ;;  %v312_v45 = vrot.slane %v311_v37, 2  ;;  %v279_v17 = vld [vmem:[%s1276_s6 + $0xf0] sm:$0xff]  ;;  %v278_v22 = vld [vmem:[%s1276_s6 + $0xe8] sm:$0xff]  ;;  %v280_v23 = vld [vmem:[%s1276_s6 + $0xf8] sm:$0xff] }
  0x76   : > { %v319_v46 = vrot.slane %v318_v38, 2  ;;  %v332_v47 = vadd.f32 %v331_v39, %v330_v31  ;;  %v299_v49 = vadd.f32 %v298_v41, %v297_v33  ;;  %v306_v50 = vadd.f32 %v305_v42, %v304_v34 }
  0x77   : > { %v286_v48 = vrot.slane %v285_v40, 1  ;;  %v326_v51 = vrot.slane %v325_v43, 2  ;;  %v293_v55 = vrot.slane %v292_v44, 1  ;;  %v313_v56 = vadd.f32 %v312_v45, %v311_v37 }
  0x78   : > { %v320_v57 = vadd.f32 %v319_v46, %v318_v38  ;;  %v333_v58 = vrot.slane %v332_v47, 2  ;;  %v300_v63 = vrot.slane %v299_v49, 1  ;;  %v307_v0 = vrot.slane %v306_v50, 1 }
  0x79   : > { %v1313_v62 = vadd.f32 %v286_v48, %v285_v40  ;;  %v327_v1 = vadd.f32 %v326_v51, %v325_v43  ;;  %v1318_v5 = vadd.f32 %v293_v55, %v292_v44  ;;  %v314_v6 = vrot.slane %v313_v56, 1 }
  0x7a   : > { %v321_v7 = vrot.slane %v320_v57, 1  ;;  %v334_v8 = vadd.f32 %v333_v58, %v332_v47  ;;  %v1323_v12 = vadd.f32 %v300_v63, %v299_v49  ;;  %v1325_v13 = vadd.f32 %v307_v0, %v306_v50 }
  0x7b   : > { %v328_v14 = vrot.slane %v327_v1, 1  ;;  %v337_v15 = vadd.f32 %v267_v54, %v265_v52  ;;  %v1329_v18 = vadd.f32 %v314_v6, %v313_v56  ;;  %v344_v21 = vadd.f32 %v268_v59, %v266_v53 }
  0x7c   : > { %v1331_v19 = vadd.f32 %v321_v7, %v320_v57  ;;  %v335_v20 = vrot.slane %v334_v8, 1  ;;  %v351_v26 = vadd.f32 %v271_v2, %v269_v60  ;;  %v358_v27 = vadd.f32 %v272_v3, %v270_v61 }
  0x7d   : > { %v1335_v24 = vadd.f32 %v328_v14, %v327_v1  ;;  %v338_v25 = vrot.slane %v337_v15, 4  ;;  %v345_v29 = vrot.slane %v344_v21, 4  ;;  %v365_v30 = vadd.f32 %v275_v10, %v273_v4 }
  0x7e   : > { %v1337_v28 = vadd.f32 %v335_v20, %v334_v8  ;;  %v372_v31 = vadd.f32 %v276_v11, %v274_v9  ;;  %v352_v33 = vrot.slane %v351_v26, 4  ;;  %v359_v34 = vrot.slane %v358_v27, 4 }
  0x7f   : > { %v339_v32 = vadd.f32 %v338_v25, %v337_v15  ;;  %v379_v35 = vadd.f32 %v279_v17, %v277_v16  ;;  %v346_v36 = vadd.f32 %v345_v29, %v344_v21  ;;  %v366_v37 = vrot.slane %v365_v30, 4 }
  0x80   : > { %v373_v38 = vrot.slane %v372_v31, 4  ;;  %v386_v39 = vadd.f32 %v280_v23, %v278_v22  ;;  %v353_v41 = vadd.f32 %v352_v33, %v351_v26  ;;  %v360_v42 = vadd.f32 %v359_v34, %v358_v27 }
  0x81   : > { %v340_v40 = vrot.slane %v339_v32, 2  ;;  %v380_v43 = vrot.slane %v379_v35, 4  ;;  %v347_v44 = vrot.slane %v346_v36, 2  ;;  %v367_v45 = vadd.f32 %v366_v37, %v365_v30 }
  0x82   : > { %v374_v46 = vadd.f32 %v373_v38, %v372_v31  ;;  %v387_v47 = vrot.slane %v386_v39, 4  ;;  %v354_v49 = vrot.slane %v353_v41, 2  ;;  %v361_v50 = vrot.slane %v360_v42, 2 }
  0x83   : > { %v341_v48 = vadd.f32 %v340_v40, %v339_v32  ;;  %v381_v51 = vadd.f32 %v380_v43, %v379_v35  ;;  %v348_v52 = vadd.f32 %v347_v44, %v346_v36  ;;  %v368_v53 = vrot.slane %v367_v45, 2 }
  0x84   : > { %v375_v54 = vrot.slane %v374_v46, 2  ;;  %v388_v55 = vadd.f32 %v387_v47, %v386_v39  ;;  %v355_v57 = vadd.f32 %v354_v49, %v353_v41  ;;  %v362_v58 = vadd.f32 %v361_v50, %v360_v42 }
  0x85   : > { %v342_v56 = vrot.slane %v341_v48, 1  ;;  %v382_v59 = vrot.slane %v381_v51, 2  ;;  %v349_v60 = vrot.slane %v348_v52, 1  ;;  %v369_v61 = vadd.f32 %v368_v53, %v367_v45 }
  0x86   : > { %v376_v63 = vadd.f32 %v375_v54, %v374_v46  ;;  %v389_v0 = vrot.slane %v388_v55, 2  ;;  %v356_v2 = vrot.slane %v355_v57, 1  ;;  %v363_v3 = vrot.slane %v362_v58, 1  ;;  %396 = sbr.rel (%p730_p4) target bundleno = 145 (0x91), region = 44 }
  0x87   : > { %v343_v1 = vadd.f32 %v342_v56, %v341_v48  ;;  %v383_v4 = vadd.f32 %v382_v59, %v381_v51  ;;  %v350_v6 = vadd.f32 %v349_v60, %v348_v52  ;;  %v370_v7 = vrot.slane %v369_v61, 1 }
  0x88   : > { %v377_v8 = vrot.slane %v376_v63, 1  ;;  %v390_v9 = vadd.f32 %v389_v0, %v388_v55  ;;  %v357_v10 = vadd.f32 %v356_v2, %v355_v57  ;;  %v364_v11 = vadd.f32 %v363_v3, %v362_v58 }
  0x89   : > { %v384_v14 = vrot.slane %v383_v4, 1  ;;  %v371_v15 = vadd.f32 %v370_v7, %v369_v61  ;;  %v414_v22 = vsel (!%p730_p4), %vm413_vm0, %v1323_v12, %v1313_v62  ;;  %v427_v25 = vsel (!%p730_p4), %vm413_vm0, %v1325_v13, %v1318_v5 }
  0x8a   : > { %v378_v16 = vadd.f32 %v377_v8, %v376_v63  ;;  %v391_v17 = vrot.slane %v390_v9, 1  ;;  %v416_v23 = vsel (!%p730_p4), %vm415_vm1, %v1329_v18, %v414_v22  ;;  %v428_v27 = vsel (!%p730_p4), %vm415_vm1, %v1331_v19, %v427_v25 }
  0x8b   : > { %v385_v20 = vadd.f32 %v384_v14, %v383_v4  ;;  %v418_v26 = vsel (!%p730_p4), %vm417_vm2, %v1335_v24, %v416_v23  ;;  %v429_v30 = vsel (!%p730_p4), %vm417_vm2, %v1337_v28, %v428_v27 }
  0x8c   : > { %v392_v21 = vadd.f32 %v391_v17, %v390_v9  ;;  %v420_v29 = vsel (!%p730_p4), %vm419_vm3, %v343_v1, %v418_v26  ;;  %v430_v32 = vsel (!%p730_p4), %vm419_vm3, %v350_v6, %v429_v30 }
  0x8d   : > { %v422_v31 = vsel %vm421_vm4, %v357_v10, %v420_v29  ;;  %v431_v34 = vsel %vm421_vm4, %v364_v11, %v430_v32 }
  0x8e   : > { %v424_v33 = vsel %vm423_vm5, %v371_v15, %v422_v31  ;;  %v432_v36 = vsel %vm423_vm5, %v378_v16, %v431_v34 }
  0x8f   : > { %v426_v35 = vsel %vm425_vm6, %v385_v20, %v424_v33  ;;  %v433_v37 = vsel %vm425_vm6, %v392_v21, %v432_v36 }
  0x90   : > { %436 = vst [vmem:[#allocation2] sm:$0xff] %v426_v35  ;;  %437 = vst [vmem:[#allocation2 + $0x8] sm:$0xff] %v433_v37 }
  0x91 PF: > { %p731_p5 = scmp.le.s32.totalorder %s1068_s18, 0 }
  0x92   : > { %vm460_vm7 = vcmask (!%p731_p5), 1041409   ;;  %vm462_vm8 = vcmask (!%p731_p5), 1042434   ;;  %vm464_vm9 = vcmask (!%p731_p5), 1043459   ;;  %vm466_vm10 = vcmask (!%p731_p5), 1044484  }
  0x93   : > { %441 = sbr.rel (%p731_p5) target bundleno = 157 (0x9d), region = 48  ;;  %v461_v38 = vsel (!%p731_p5), %vm460_vm7, %v1323_v12, %v1313_v62  ;;  %vm468_vm11 = vcmask (!%p731_p5), 1045509   ;;  %v474_v40 = vsel (!%p731_p5), %vm460_vm7, %v1325_v13, %v1318_v5  ;;  %vm470_vm12 = vcmask (!%p731_p5), 1046534  }
  0x94   : > { %v463_v39 = vsel (!%p731_p5), %vm462_vm8, %v1329_v18, %v461_v38  ;;  %v475_v42 = vsel (!%p731_p5), %vm462_vm8, %v1331_v19, %v474_v40  ;;  %vm472_vm13 = vcmask (!%p731_p5), 1047559  }
  0x95   : > { %v465_v41 = vsel (!%p731_p5), %vm464_vm9, %v1335_v24, %v463_v39  ;;  %v476_v44 = vsel (!%p731_p5), %vm464_vm9, %v1337_v28, %v475_v42 }
  0x96   : > { %v467_v43 = vsel (!%p731_p5), %vm466_vm10, %v343_v1, %v465_v41  ;;  %v477_v47 = vsel (!%p731_p5), %vm466_vm10, %v350_v6, %v476_v44 }
  0x97   : > { %v442_v45 = vld [vmem:[#allocation2] sm:$0xff] (!%p731_p5)  ;;  %v469_v46 = vsel (!%p731_p5), %vm468_vm11, %v357_v10, %v467_v43  ;;  %v443_v12 = vld [vmem:[#allocation2 + $0x8] sm:$0xff] (!%p731_p5)  ;;  %v478_v48 = vsel (!%p731_p5), %vm468_vm11, %v364_v11, %v477_v47 }
  0x98   : > { %v471_v62 = vsel (!%p731_p5), %vm470_vm12, %v371_v15, %v469_v46  ;;  %v479_v49 = vsel (!%p731_p5), %vm470_vm12, %v378_v16, %v478_v48 }
  0x99   : > { %v473_v18 = vsel (!%p731_p5), %vm472_vm13, %v385_v20, %v471_v62  ;;  %v480_v51 = vsel (!%p731_p5), %vm472_vm13, %v392_v21, %v479_v49 }
  0x9a   : > { %v483_v50 = vadd.f32 %v473_v18, %v442_v45  ;;  %v484_v5 = vadd.f32 %v480_v51, %v443_v12 }
  0x9c   : > { %485 = vst [vmem:[#allocation2] sm:$0xff] %v483_v50  ;;  %486 = vst [vmem:[#allocation2 + $0x8] sm:$0xff] %v484_v5 }
  0x9d PF: > { %p732_p9 = scmp.ne.s32.totalorder %s1068_s18, 3 }
  0x9e   : > { %v511_v13 = vld [vmem:[#allocation6 + $0x80] sm:$0xff] (!%p732_p9)  ;;  %v512_v19 = vld [vmem:[#allocation6 + $0x88] sm:$0xff] (!%p732_p9)  ;;  %v513_v53 = vld [vmem:[#allocation6 + $0x90] sm:$0xff] (!%p732_p9) }
  0x9f   : > { %490 = sbr.rel (%p732_p9) target bundleno = 411 (0x19b), region = 52  ;;  %v495_v24 = vld [vmem:[#allocation6] sm:$0xff] (!%p732_p9)  ;;  %v775_v28 = vpack.c.bf16 (!%p732_p9), %v512_v19, %v511_v13  ;;  %v496_v52 = vld [vmem:[#allocation6 + $0x8] sm:$0xff] (!%p732_p9)  ;;  %v514_v54 = vld [vmem:[#allocation6 + $0x98] sm:$0xff] (!%p732_p9) }
  0xa0   : > { %v777_v55 = vpack.c.bf16 (!%p732_p9), %v496_v52, %v495_v24  ;;  %v779_v56 = vpack.c.bf16 (!%p732_p9), %v514_v54, %v513_v53  ;;  %v497_v57 = vld [vmem:[#allocation6 + $0x10] sm:$0xff] (!%p732_p9)  ;;  %v498_v58 = vld [vmem:[#allocation6 + $0x18] sm:$0xff] (!%p732_p9)  ;;  %v515_v59 = vld [vmem:[#allocation6 + $0xa0] sm:$0xff] (!%p732_p9) }
  0xa1   : > { %776 = vmatprep.subr.bf16.mxu0 (!%p732_p9), %v775_v28  ;;  %v516_v60 = vld [vmem:[#allocation6 + $0xa8] sm:$0xff] (!%p732_p9)  ;;  %v781_v61 = vpack.c.bf16 (!%p732_p9), %v498_v58, %v497_v57  ;;  %v499_v0 = vld [vmem:[#allocation6 + $0x20] sm:$0xff] (!%p732_p9)  ;;  %v517_v2 = vld [vmem:[#allocation6 + $0xb0] sm:$0xff] (!%p732_p9) }
  0xa2   : > { %778 = vmatpush3.bf16.msra.mxu0 (!%p732_p9), %v777_v55  ;;  %v783_v63 = vpack.c.bf16 (!%p732_p9), %v516_v60, %v515_v59  ;;  %v500_v1 = vld [vmem:[#allocation6 + $0x28] sm:$0xff] (!%p732_p9)  ;;  %v518_v3 = vld [vmem:[#allocation6 + $0xb8] sm:$0xff] (!%p732_p9)  ;;  %v501_v7 = vld [vmem:[#allocation6 + $0x30] sm:$0xff] (!%p732_p9) }
  0xa3   : > { %780 = vmatprep.subr.bf16.mxu0 (!%p732_p9), %v779_v56  ;;  %v785_v4 = vpack.c.bf16 (!%p732_p9), %v500_v1, %v499_v0  ;;  %v787_v6 = vpack.c.bf16 (!%p732_p9), %v518_v3, %v517_v2  ;;  %v502_v8 = vld [vmem:[#allocation6 + $0x38] sm:$0xff] (!%p732_p9)  ;;  %v519_v9 = vld [vmem:[#allocation6 + $0xc0] sm:$0xff] (!%p732_p9)  ;;  %v520_v10 = vld [vmem:[#allocation6 + $0xc8] sm:$0xff] (!%p732_p9) }
  0xa4   : > { %v492_v11 = vld [vmem:[#allocation2 + $0x8] sm:$0xff] (!%p732_p9)  ;;  %v789_v15 = vpack.c.bf16 (!%p732_p9), %v502_v8, %v501_v7  ;;  %v791_v16 = vpack.c.bf16 (!%p732_p9), %v520_v10, %v519_v9  ;;  %v503_v17 = vld [vmem:[#allocation6 + $0x40] sm:$0xff] (!%p732_p9)  ;;  %v504_v20 = vld [vmem:[#allocation6 + $0x48] sm:$0xff] (!%p732_p9) }
  0xa5   : > { %v494_v14 = vmul.f32 (!%p732_p9), 0.02, %v492_v11  ;;  %v521_v21 = vld [vmem:[#allocation6 + $0xd0] sm:$0xff] (!%p732_p9)  ;;  %v522_v22 = vld [vmem:[#allocation6 + $0xd8] sm:$0xff] (!%p732_p9)  ;;  %v793_v23 = vpack.c.bf16 (!%p732_p9), %v504_v20, %v503_v17  ;;  %v523_v29 = vld [vmem:[#allocation6 + $0xe0] sm:$0xff] (!%p732_p9) }
  0xa6   : > { %782 = vmatpush3.bf16.msra.mxu0 %v781_v61  ;;  %v795_v25 = vpack.c.bf16 %v522_v22, %v521_v21  ;;  %v505_v26 = vld [vmem:[#allocation6 + $0x50] sm:$0xff]  ;;  %v506_v27 = vld [vmem:[#allocation6 + $0x58] sm:$0xff]  ;;  %v524_v30 = vld [vmem:[#allocation6 + $0xe8] sm:$0xff] }
  0xa7   : > { %784 = vmatprep.subr.bf16.mxu0 %v783_v63  ;;  %598 = vmatprep.mubr.f32.mxu0 %v494_v14  ;;  %v797_v31 = vpack.c.bf16 %v506_v27, %v505_v26  ;;  %v799_v32 = vpack.c.bf16 %v524_v30, %v523_v29  ;;  %v507_v33 = vld [vmem:[#allocation6 + $0x60] sm:$0xff]  ;;  %v508_v34 = vld [vmem:[#allocation6 + $0x68] sm:$0xff]  ;;  %v525_v35 = vld [vmem:[#allocation6 + $0xf0] sm:$0xff] }
  0xa8   : > { %v526_v36 = vld [vmem:[#allocation6 + $0xf8] sm:$0xff]  ;;  %v801_v37 = vpack.c.bf16 %v508_v34, %v507_v33  ;;  %v509_v39 = vld [vmem:[#allocation6 + $0x70] sm:$0xff] }
  0xa9   : > { %v803_v38 = vpack.c.bf16 %v526_v36, %v525_v35  ;;  %v510_v40 = vld [vmem:[#allocation6 + $0x78] sm:$0xff]  ;;  %v491_v42 = vld [vmem:[#allocation2] sm:$0xff] }
  0xaa   : > { %786 = vmatpush3.bf16.msra.mxu0 %v785_v4  ;;  %v805_v41 = vpack.c.bf16 %v510_v40, %v509_v39  ;;  %v493_v43 = vmul.f32 0.02, %v491_v42  ;;  %v733_v45 = vld [vmem:[%s1430_s2] ss:$0 sm:$0xff] }
  0xab   : > { %788 = vmatprep.subr.bf16.mxu0 %v787_v6 }
  0xae   : > { %790 = vmatpush3.bf16.msra.mxu0 %v789_v15 }
  0xaf   : > { %792 = vmatprep.subr.bf16.mxu0 %v791_v16 }
  0xb2   : > { %794 = vmatpush3.bf16.msra.mxu0 %v793_v23 }
  0xb3   : > { %796 = vmatprep.subr.bf16.mxu0 %v795_v25 }
  0xb6   : > { %798 = vmatpush3.bf16.msra.mxu0 %v797_v31 }
  0xb7   : > { %800 = vmatprep.subr.bf16.mxu0 %v799_v32 }
  0xba   : > { %802 = vmatpush3.bf16.msra.mxu0 %v801_v37 }
  0xbb   : > { %804 = vmatprep.subr.bf16.mxu0 %v803_v38 }
  0xbe   : > { %806 = vmatpush3.bf16.msra.mxu0 %v805_v41 }
  0xc1   : > { %599 = vmatmul.mubr.f32.vlgmr.msra.gmra.mrb[0].mxu0 %v493_v43 }
 0x194   : > { %v772_v44 = vpop.f32.mrb[0].mxu0 }
 0x195   : > { %v773_v46 = vpop.f32.mrb[1].mxu0 }
 0x196   : > { %v774_v47 = vadd.f32 %v773_v46, %v772_v44 }
 0x198   : > { %v601_v62 = vadd.f32 %v774_v47, %v733_v45 }
 0x19a   : > { %604 = vst [vmem:[%s246_s30] sm:$0xff] %v601_v62 }
 0x19b PF: > { %s735_s15 = sshll.u32 %s1072_s19, 7  ;;  %s619_s10 = sshll.u32 %s246_s30, 4  ;;  %s620_s10 = int_to_ptr.vmem [resolvable:$true] %s619_s10 }
 0x19c   : > { %s1368_s7 = scalar_lea.hbm %s1431_s3, %s735_s15  ;;  %s606_s23 = scalar_lea.sflag [#allocation5], %s244_s21 }
 0x19d   : > { %s958_s27 = scalar_lea.vmem %s620_s10, 128  ;;  %p1461_p13 = scmp.ne.s32.totalorder %s1450_s8, 0 }
 0x19e   : > { %p959_p11 = scmp.ne.s32.totalorder %s620_s10, %s958_s27  ;;  %s1095_s26 = smov [#allocation8]  }
 0x19f   : > { %s962_s24 = sshll.u32 %s1095_s26, 4  ;;  %s963_s24 = int_to_ptr.vmem [resolvable:$false] %s962_s24 }
 0x1a0   : > { %p960_p0 = pnand %p959_p11, %p1461_p13  ;;  %s964_s1 = scalar_lea.vmem %s963_s24, 256 }
 0x1a1   : > { %p965_p2 = scmp.lt.s32.totalorder %s620_s10, %s963_s24  ;;  %p966_p8 = scmp.lt.s32.totalorder %s964_s1, %s958_s27 }
 0x1a2   : > { %p961_p1 = pneg %p960_p0 }
 0x1a3   : > { %p967_p10 = por %p966_p8, %p965_p2 }
 0x1a5   : > { %p968_p3 = pnand %p967_p10, %p961_p1 }
 0x1a7   : > { %971 = shalt.err (!%p968_p3)
}
 0x1a8   : > { %s972_s19 = scalar_lea.hbm %s1368_s7, 128  ;;  %s976_s28 = scalar_lea.hbm %s1431_s3, 256 }
 0x1a9   : > { %p973_p6 = scmp.ne.s32.totalorder %s1368_s7, %s972_s19  ;;  %p977_p4 = scmp.lt.u32.totalorder %s1368_s7, %s1431_s3 }
 0x1aa   : > { %p978_p5 = scmp.lt.u32.totalorder %s976_s28, %s972_s19  ;;  %p980_p11 = scmp.lt.u32.totalorder %s972_s19, %s1368_s7 }
 0x1ab   : > { %p974_p7 = pnand %p973_p6, %p1461_p13 }
 0x1ac   : > { %p979_p9 = por %p978_p5, %p977_p4 }
 0x1ad   : > { %p975_p12 = pneg %p974_p7 }
 0x1ae   : > { %p981_p0 = por %p980_p11, %p979_p9 }
 0x1b0   : > { %p982_p1 = pnand %p981_p0, %p975_p12 }
 0x1b2   : > { %985 = shalt.err (!%p982_p1)
}
 0x1b3   : > { %820 = dma.vmem_to_hbm [thread:$0]  (%p1461_p13), %s620_s10, 128, %s1368_s7, %s606_s23  }
 0x1b4 PF: > { %p832_p2 = scmp.ge.s32.totalorder %s1084_s22, 2  ;;  %s631_s29 = sand.u32 1, %s1044_s12  }
 0x1b5   : > { %p1462_p8 = scmp.ne.s32.totalorder %s1453_s11, 0  ;;  %s632_s30 = scalar_lea.sflag [#allocation5], %s631_s29 }
 0x1b7   : > { %p827_p10 = pnand %p832_p2, %p1462_p8 }
 0x1b9   : > { %1039 = dma.done.wait (!%p827_p10), %s632_s30, 128  }
 0x1ba   : > { %1041 = vsyncadd (!%p827_p10), %s632_s30, 4294967168  ;;  %s20_s22 = sadd.s32 1, %s1084_s22   ;;  %s1463_s18 = sld [smem:[#allocation19_spill]] }
 0x1bb   : > { %p17_p3 = scmp.ge.s32.totalorder %s20_s22, 10   ;;  %s1464_s8 = sld [smem:[#allocation20_spill]] }
 0x1bc   : > { %s1465_s5 = sld [smem:[#allocation15_spill]]  ;;  %s1466_s19 = sld [smem:[#allocation16_spill]] }
 0x1bd   : > { %s1467_s20 = sld [smem:[#allocation17_spill]]  ;;  %s1468_s21 = sld [smem:[#allocation18_spill]] }
 0x1be   : > { %s1469_s12 = smov %s1048_s13  ;;  %s1470_s13 = smov %s1052_s14 }
 0x1bf   : > { %s1472_s15 = smov %s1060_s16  ;;  %s1473_s16 = smov %s1064_s17 }
 0x1c0   : > { %s1471_s14 = smov %s1463_s18  ;;  %19 = sbr.rel (!%p17_p3) target bundleno = 12 (0xc), region = 98 }
 0x1c1   : > { %s1474_s17 = smov %s1464_s8 }
 0x1c2   : > { %s1475_s18 = smov %s1465_s5 }
 0x1c7   :  { %637 = vsyncpa [#allocation4], 1 }
 0x1c8   :  { %639 = vsyncpa [#allocation4 + $0x1], 1 }
 0x1c9   :  { %640 = vsyncpa [#allocation7], 1 }
 0x1ca   :  { %641 = vsyncpa [#allocation5], 1 }
 0x1cb   :  { %643 = vsyncpa [#allocation5 + $0x1], 1 }

</bundles_post_ra>
